<compile_context>
chip_gen: v6e
topology: v6e:2x2x1
jax: 0.10.0
libtpu: 0.0.40
codegen_flags: <defaults>
</compile_context>

<pallas_src>
import jax
import jax.numpy as jnp
from jax import lax
from jax.experimental import pallas as pl
from jax.experimental.pallas import tpu as pltpu

_MIB = 1024 * 1024


def _round_up(a, b):
    return (a + b - 1) // b * b


def _ffn_kernel(x_ref, w1t_ref, b1_ref, w2t_ref, b2_ref, o_ref, acc_ref):
    # x_ref:   (tm, d_in)      row tile of flattened input (input dtype)
    # w1t_ref: (d_in, tH)      fc1 weight, K-major, compute dtype
    # b1_ref:  (1, tH)         f32
    # w2t_ref: (tH, d_out)     fc2 weight, K-major, compute dtype
    # b2_ref:  (1, d_out)      f32
    # o_ref:   (tm, d_out)
    # acc_ref: (tm, d_out) f32 accumulator across the hidden (K) grid axis
    k = pl.program_id(1)
    nk = pl.num_programs(1)

    x = x_ref[...].astype(w1t_ref.dtype)
    # Canonical (M,K)@(K,N) contraction -> no weight transpose in the loop.
    h = jnp.dot(x, w1t_ref[...], preferred_element_type=jnp.float32)
    h = jnp.maximum(h + b1_ref[...], 0.0)                     # ReLU in f32
    partial = jnp.dot(h.astype(w2t_ref.dtype), w2t_ref[...],
                      preferred_element_type=jnp.float32)

    @pl.when(k == 0)
    def _():
        acc_ref[...] = partial

    @pl.when(k > 0)
    def _():
        acc_ref[...] += partial

    @pl.when(k == nk - 1)
    def _():
        o_ref[...] = (acc_ref[...] + b2_ref[...]).astype(o_ref.dtype)


def position_wise_ffn(x, w1, b1, w2, b2, *, tm=None, th=512,
                      compute_dtype=jnp.bfloat16, vmem_limit_bytes=None):
    """x: (batch, seq, d_in).
    w1: (hidden, d_in), b1: (hidden,), w2: (d_out, hidden), b2: (d_out,)
    -- torch nn.Linear layout (transposed/cast once here, K-major in kernel)."""
    batch, seq, d_in = x.shape
    hidden = w1.shape[0]
    d_out = w2.shape[0]
    M = batch * seq

    try:
        vmem_cap = int(pltpu.get_tpu_info().vmem_capacity_bytes)
    except Exception:  # conservative fallback if the query is unavailable
        vmem_cap = 64 * _MIB

    # Row (M) tiling: per-generation default, always a multiple of 8; partial
    # last block is handled by Pallas (no wrapper pad / slice).
    if tm is None:
        tm = 256 if vmem_cap <= 64 * _MIB else 512
    tm = max(8, _round_up(tm, 8))
    tm_eff = min(tm, _round_up(M, 8))
    grid_m = pl.cdiv(M, tm_eff)

    # Hidden (K) tiling: zero-pad hidden to a tile multiple when tiled (exact).
    if hidden <= th:
        th_eff = hidden
        h_pad = hidden
    else:
        th_eff = _round_up(th, 128)
        h_pad = _round_up(hidden, th_eff)
    grid_h = h_pad // th_eff

    # One-time K-major + compute-dtype weight copies (amortized over all rows).
    w1t = w1.T.astype(compute_dtype)                    # (d_in, hidden)
    w2t = w2.T.astype(compute_dtype)                    # (hidden, d_out)
    b1_2d = b1.reshape(1, hidden).astype(jnp.float32)
    b2_2d = b2.reshape(1, d_out).astype(jnp.float32)
    if h_pad != hidden:
        w1t = jnp.pad(w1t, ((0, 0), (0, h_pad - hidden)))
        w2t = jnp.pad(w2t, ((0, h_pad - hidden), (0, 0)))
        b1_2d = jnp.pad(b1_2d, ((0, 0), (0, h_pad - hidden)))

    x2d = x.reshape(M, d_in)

    x_isz = jnp.dtype(x.dtype).itemsize
    c_isz = jnp.dtype(compute_dtype).itemsize
    w_reads = grid_m if grid_h > 1 else 1   # weights re-streamed only when K-tiled
    flops = 2 * M * (d_in * h_pad + h_pad * d_out)
    bytes_accessed = (M * (d_in + d_out) * x_isz
                      + w_reads * (h_pad * (d_in + d_out) * c_isz + h_pad * 4)
                      + d_out * 4)
    cost = pl.CostEstimate(flops=flops, transcendentals=0,
                           bytes_accessed=int(bytes_accessed))

    # Single-buffer the weight/bias blocks when their index never changes.
    w_buf = pl.Buffered(1) if grid_h == 1 else None

    if vmem_limit_bytes is None:
        w_nbuf = 1 if grid_h == 1 else 2
        need = (2 * tm_eff * d_in * x_isz                        # x tiles
                + 2 * tm_eff * d_out * x_isz                     # out tiles
                + w_nbuf * (d_in + d_out) * th_eff * c_isz       # w1t/w2t tiles
                + w_nbuf * th_eff * 4 + d_out * 4                # biases
                + tm_eff * d_out * 4                             # accumulator
                + tm_eff * th_eff * 4)                           # f32 hidden temp
        vmem_limit_bytes = int(min(vmem_cap - 8 * _MIB,
                                   max(32 * _MIB, need + 8 * _MIB)))

    out2d = pl.pallas_call(
        _ffn_kernel,
        out_shape=jax.ShapeDtypeStruct((M, d_out), x.dtype),
        grid_spec=pltpu.PrefetchScalarGridSpec(
            num_scalar_prefetch=0,
            grid=(grid_m, grid_h),
            in_specs=[
                pl.BlockSpec((tm_eff, d_in), lambda i, k: (i, 0)),
                pl.BlockSpec((d_in, th_eff), lambda i, k: (0, k),
                             pipeline_mode=w_buf),
                pl.BlockSpec((1, th_eff), lambda i, k: (0, k),
                             pipeline_mode=w_buf),
                pl.BlockSpec((th_eff, d_out), lambda i, k: (k, 0),
                             pipeline_mode=w_buf),
                pl.BlockSpec((1, d_out), lambda i, k: (0, 0),
                             pipeline_mode=pl.Buffered(1)),
            ],
            out_specs=pl.BlockSpec((tm_eff, d_out), lambda i, k: (i, 0)),
            scratch_shapes=[pltpu.VMEM((tm_eff, d_out), jnp.float32)],
        ),
        compiler_params=pltpu.CompilerParams(
            dimension_semantics=("parallel", "arbitrary"),
            vmem_limit_bytes=vmem_limit_bytes,
        ),
        cost_estimate=cost,
    )(x2d, w1t, b1_2d, w2t, b2_2d)

    return out2d.reshape(batch, seq, d_out)


def _reference(x, w1, b1, w2, b2, compute_dtype=jnp.bfloat16):
    # Matches the kernel's numerics: bf16 matmul operands, f32 accumulation,
    # f32 bias + ReLU.
    xq = x.reshape(-1, x.shape[-1]).astype(compute_dtype)
    h = lax.dot_general(xq, w1.astype(compute_dtype),
                        dimension_numbers=(((1,), (1,)), ((), ())),
                        preferred_element_type=jnp.float32)
    h = jnp.maximum(h + b1.astype(jnp.float32), 0.0)
    y = lax.dot_general(h.astype(compute_dtype), w2.astype(compute_dtype),
                        dimension_numbers=(((1,), (1,)), ((), ())),
                        preferred_element_type=jnp.float32)
    y = y + b2.astype(jnp.float32)
    return y.reshape(*x.shape[:-1], w2.shape[0]).astype(x.dtype)


if __name__ == "__main__":
    key = jax.random.PRNGKey(0)
    ks = jax.random.split(key, 9)

    batch, seq = 2, 8
    d_in, hidden, d_out = 128, 256, 128

    x = jax.random.normal(ks[0], (batch, seq, d_in), jnp.float32)
    # Torch nn.Linear layouts.
    w1 = jax.random.normal(ks[1], (hidden, d_in), jnp.float32) * 0.1
    b1 = jax.random.normal(ks[2], (hidden,), jnp.float32) * 0.1
    w2 = jax.random.normal(ks[3], (d_out, hidden), jnp.float32) * 0.1
    b2 = jax.random.normal(ks[4], (d_out,), jnp.float32) * 0.1

    out = jax.block_until_ready(position_wise_ffn(x, w1, b1, w2, b2))
    ref = _reference(x, w1, b1, w2, b2)
    assert out.shape == (batch, seq, d_out)
    assert jnp.allclose(out, ref, atol=1e-2, rtol=1e-2), "mismatch vs reference"

    # Case 2: M = batch*seq not a multiple of 8 -> partial last row block.
    x_odd = jax.random.normal(ks[5], (3, 5, d_in), jnp.float32)
    out_odd = jax.block_until_ready(position_wise_ffn(x_odd, w1, b1, w2, b2))
    ref_odd = _reference(x_odd, w1, b1, w2, b2)
    assert out_odd.shape == (3, 5, d_out)
    assert jnp.allclose(out_odd, ref_odd, atol=1e-2, rtol=1e-2), "partial-row mismatch"

    # Case 3: hidden tiled over K (hidden=384, th=256 -> zero-padded to 512,
    # two accumulation steps) -> exercises pl.when init/accumulate/finalize.
    hidden_b = 384
    w1b = jax.random.normal(ks[6], (hidden_b, d_in), jnp.float32) * 0.1
    b1b = jax.random.normal(ks[7], (hidden_b,), jnp.float32) * 0.1
    w2b = jax.random.normal(ks[8], (d_out, hidden_b), jnp.float32) * 0.1
    out_k = jax.block_until_ready(
        position_wise_ffn(x, w1b, b1b, w2b, b2, th=256))
    ref_k = _reference(x, w1b, b1b, w2b, b2)
    assert jnp.allclose(out_k, ref_k, atol=1e-2, rtol=1e-2), "K-tiled mismatch"

    print("KERNEL_OK")
</pallas_src>

<mosaic_0001>
module attributes {stable_mosaic.version = 11 : i64} {
  func.func @_ffn_kernel(%arg0: i32, %arg1: i32, %arg2: memref<16x128xf32, #tpu.memory_space<vmem>>, %arg3: memref<128x256xbf16, #tpu.memory_space<vmem>>, %arg4: memref<1x256xf32, #tpu.memory_space<vmem>>, %arg5: memref<256x128xbf16, #tpu.memory_space<vmem>>, %arg6: memref<1x128xf32, #tpu.memory_space<vmem>>, %arg7: memref<16x128xf32, #tpu.memory_space<vmem>>, %arg8: memref<16x128xf32, #tpu.memory_space<vmem>>) attributes {dimension_semantics = [#tpu.dimension_semantics<parallel>, #tpu.dimension_semantics<arbitrary>], iteration_bounds = array<i64: 1, 1>, scalar_prefetch = 0 : i64, scratch_operands = 1 : i64, tpu.core_type = #tpu.core_type<tc>, window_params = [{transform_indices = @transform_0, window_bounds = array<i64: 16, 128>}, {pipeline_mode = #tpu.pipeline_mode<synchronous>, transform_indices = @transform_1, window_bounds = array<i64: 128, 256>}, {pipeline_mode = #tpu.pipeline_mode<synchronous>, transform_indices = @transform_2, window_bounds = array<i64: 1, 256>}, {pipeline_mode = #tpu.pipeline_mode<synchronous>, transform_indices = @transform_3, window_bounds = array<i64: 256, 128>}, {pipeline_mode = #tpu.pipeline_mode<synchronous>, transform_indices = @transform_4, window_bounds = array<i64: 1, 128>}, {transform_indices = @transform_5, window_bounds = array<i64: 16, 128>}]} {
    %c0 = arith.constant 0 : index
    %c0_0 = arith.constant 0 : index
    %0 = vector.load %arg2[%c0, %c0_0] : memref<16x128xf32, #tpu.memory_space<vmem>>, vector<16x128xf32>
    %1 = arith.truncf %0 : vector<16x128xf32> to vector<16x128xbf16>
    %c0_1 = arith.constant 0 : index
    %c0_2 = arith.constant 0 : index
    %2 = vector.load %arg3[%c0_1, %c0_2] : memref<128x256xbf16, #tpu.memory_space<vmem>>, vector<128x256xbf16>
    %cst = arith.constant dense<0.000000e+00> : vector<16x256xf32>
    %3 = tpu.matmul %1, %2, %cst {dimension_numbers = #tpu.dot_dimension_numbers<[1], [0], [0], [1], [0, 0, 1, 1], [], []>} : vector<16x128xbf16>, vector<128x256xbf16>, vector<16x256xf32> -> vector<16x256xf32>
    %c0_3 = arith.constant 0 : index
    %c0_4 = arith.constant 0 : index
    %4 = vector.load %arg4[%c0_3, %c0_4] : memref<1x256xf32, #tpu.memory_space<vmem>>, vector<1x256xf32>
    %5 = vector.broadcast %4 : vector<1x256xf32> to vector<16x256xf32>
    %6 = arith.addf %3, %5 : vector<16x256xf32>
    %cst_5 = arith.constant 0.000000e+00 : f32
    %7 = vector.broadcast %cst_5 : f32 to vector<16x256xf32>
    %8 = arith.maximumf %6, %7 : vector<16x256xf32>
    %9 = arith.truncf %8 : vector<16x256xf32> to vector<16x256xbf16>
    %c0_6 = arith.constant 0 : index
    %c0_7 = arith.constant 0 : index
    %10 = vector.load %arg5[%c0_6, %c0_7] : memref<256x128xbf16, #tpu.memory_space<vmem>>, vector<256x128xbf16>
    %cst_8 = arith.constant dense<0.000000e+00> : vector<16x128xf32>
    %11 = tpu.matmul %9, %10, %cst_8 {dimension_numbers = #tpu.dot_dimension_numbers<[1], [0], [0], [1], [0, 0, 1, 1], [], []>} : vector<16x256xbf16>, vector<256x128xbf16>, vector<16x128xf32> -> vector<16x128xf32>
    %c0_i32 = arith.constant 0 : i32
    %12 = arith.cmpi eq, %arg1, %c0_i32 : i32
    %13 = arith.extui %12 : i1 to i32
    %c0_i32_9 = arith.constant 0 : i32
    %14 = arith.cmpi ne, %13, %c0_i32_9 : i32
    scf.if %14 {
      %c0_14 = arith.constant 0 : index
      %c0_15 = arith.constant 0 : index
      %21 = vector.load %arg8[%c0_14, %c0_15] : memref<16x128xf32, #tpu.memory_space<vmem>>, vector<16x128xf32>
      tpu.vector_store %arg8[%c0_14, %c0_15], %11 {strides = array<i32>} : memref<16x128xf32, #tpu.memory_space<vmem>>, vector<16x128xf32>,
    } else {
    }
    %c0_i32_10 = arith.constant 0 : i32
    %15 = arith.cmpi sgt, %arg1, %c0_i32_10 : i32
    %16 = arith.extui %15 : i1 to i32
    %c0_i32_11 = arith.constant 0 : i32
    %17 = arith.cmpi ne, %16, %c0_i32_11 : i32
    scf.if %17 {
      %c0_14 = arith.constant 0 : index
      %c0_15 = arith.constant 0 : index
      %21 = vector.load %arg8[%c0_14, %c0_15] : memref<16x128xf32, #tpu.memory_space<vmem>>, vector<16x128xf32>
      %22 = arith.addf %21, %11 : vector<16x128xf32>
      %c0_16 = arith.constant 0 : index
      %c0_17 = arith.constant 0 : index
      %23 = vector.load %arg8[%c0_16, %c0_17] : memref<16x128xf32, #tpu.memory_space<vmem>>, vector<16x128xf32>
      tpu.vector_store %arg8[%c0_16, %c0_17], %22 {strides = array<i32>} : memref<16x128xf32, #tpu.memory_space<vmem>>, vector<16x128xf32>,
    } else {
    }
    %c0_i32_12 = arith.constant 0 : i32
    %18 = arith.cmpi eq, %arg1, %c0_i32_12 : i32
    %19 = arith.extui %18 : i1 to i32
    %c0_i32_13 = arith.constant 0 : i32
    %20 = arith.cmpi ne, %19, %c0_i32_13 : i32
    scf.if %20 {
      %c0_14 = arith.constant 0 : index
      %c0_15 = arith.constant 0 : index
      %21 = vector.load %arg8[%c0_14, %c0_15] : memref<16x128xf32, #tpu.memory_space<vmem>>, vector<16x128xf32>
      %c0_16 = arith.constant 0 : index
      %c0_17 = arith.constant 0 : index
      %22 = vector.load %arg6[%c0_16, %c0_17] : memref<1x128xf32, #tpu.memory_space<vmem>>, vector<1x128xf32>
      %23 = vector.broadcast %22 : vector<1x128xf32> to vector<16x128xf32>
      %24 = arith.addf %21, %23 : vector<16x128xf32>
      %c0_18 = arith.constant 0 : index
      %c0_19 = arith.constant 0 : index
      %25 = vector.load %arg7[%c0_18, %c0_19] : memref<16x128xf32, #tpu.memory_space<vmem>>, vector<16x128xf32>
      tpu.vector_store %arg7[%c0_18, %c0_19], %24 {strides = array<i32>} : memref<16x128xf32, #tpu.memory_space<vmem>>, vector<16x128xf32>,
    } else {
    }
    return
  }
  func.func @transform_0(%arg0: i32, %arg1: i32) -> (i32, i32) {
    %c0_i32 = arith.constant 0 : i32
    %c0_i32_0 = arith.constant 0 : i32
    return %arg0, %c0_i32 : i32, i32
  }
  func.func @transform_1(%arg0: i32, %arg1: i32) -> (i32, i32) {
    %c0_i32 = arith.constant 0 : i32
    %c0_i32_0 = arith.constant 0 : i32
    return %c0_i32, %arg1 : i32, i32
  }
  func.func @transform_2(%arg0: i32, %arg1: i32) -> (i32, i32) {
    %c0_i32 = arith.constant 0 : i32
    %c0_i32_0 = arith.constant 0 : i32
    return %c0_i32, %arg1 : i32, i32
  }
  func.func @transform_3(%arg0: i32, %arg1: i32) -> (i32, i32) {
    %c0_i32 = arith.constant 0 : i32
    %c0_i32_0 = arith.constant 0 : i32
    return %arg1, %c0_i32 : i32, i32
  }
  func.func @transform_4(%arg0: i32, %arg1: i32) -> (i32, i32) {
    %c0_i32 = arith.constant 0 : i32
    %c0_i32_0 = arith.constant 0 : i32
    %c0_i32_1 = arith.constant 0 : i32
    return %c0_i32, %c0_i32_0 : i32, i32
  }
  func.func @transform_5(%arg0: i32, %arg1: i32) -> (i32, i32) {
    %c0_i32 = arith.constant 0 : i32
    %c0_i32_0 = arith.constant 0 : i32
    return %arg0, %c0_i32 : i32, i32
  }
}

</mosaic_0001>

<bundles_post_ra>
// kernel: tpu_custom_call.1
= control target key start
LH: loop header
LB: loop body
LE: loop exit
PB: predicated region body
PF: predicated region fallthrough
CT: control target
= control target key end

     0   :  { %10 = vsyncpa [#allocation4], 0  ;;  %s698_s0 = inlined_call_operand.hbm [shape: f32[16,128], index: 0, kind: input, shape index: {}]   ;;  %s699_s1 = inlined_call_operand.hbm [shape: bf16[128,256], index: 1, kind: input, shape index: {}]   ;;  %s700_s2 = inlined_call_operand.vmem [shape: f32[1,256], index: 2, kind: input, shape index: {}]   ;;  %s701_s3 = inlined_call_operand.hbm [shape: bf16[256,128], index: 3, kind: input, shape index: {}]   ;;  %s702_s4 = inlined_call_operand.vmem [shape: f32[1,128], index: 4, kind: input, shape index: {}]   ;;  %s703_s5 = inlined_call_operand.hbm [shape: f32[16,128], index: 5, kind: output, shape index: {}]  }
   0x1   :  { %11 = vsyncpa [#allocation7], 0 }
   0x2   :  { %12 = vsyncpa [#allocation5], 0  ;;  %s632_s18 = smov [#allocation6]   ;;  %s633_s20 = smov [#allocation3]  }
   0x3   :  { %s30_s19 = sshll.u32 %s632_s18, 4  ;;  %s18_s21 = sshll.u32 %s633_s20, 4  ;;  %s31_s19 = int_to_ptr.vmem [resolvable:$true] %s30_s19  ;;  %s19_s21 = int_to_ptr.vmem [resolvable:$true] %s18_s21 }
   0x4   :  { %s554_s22 = scalar_lea.vmem %s31_s19, 2048  ;;  %p559_p1 = scmp.lt.s32.totalorder %s31_s19, %s31_s19 }
   0x5   :  { %p555_p0 = scmp.ne.s32.totalorder %s31_s19, %s554_s22  ;;  %p560_p2 = scmp.lt.s32.totalorder %s554_s22, %s554_s22 }
   0x7   :  { %p561_p3 = por %p560_p2, %p559_p1 }
   0x9   :  { %p562_p4 = pnand %p561_p3, %p555_p0 }
   0xb   :  { %565 = shalt.err (!%p562_p4)
}
   0xc   :  { %s634_s23 = smov 128   ;;  %s635_s24 = smov 8  }
   0xd   :  { %36 = dma.hbm_to_vmem [thread:$0]  %s699_s1, 2048, %s31_s19, [#allocation7], %s634_s23, %s634_s23, %s635_s24  }
   0xe   :  { %s574_s27 = scalar_lea.vmem %s19_s21, 256  ;;  %p579_p6 = scmp.lt.s32.totalorder %s19_s21, %s19_s21 }
   0xf   :  { %p575_p5 = scmp.ne.s32.totalorder %s19_s21, %s574_s27  ;;  %p580_p7 = scmp.lt.s32.totalorder %s574_s27, %s574_s27 }
  0x11   :  { %p581_p8 = por %p580_p7, %p579_p6 }
  0x13   :  { %p582_p9 = pnand %p581_p8, %p575_p5 }
  0x15   :  { %585 = shalt.err (!%p582_p9)
}
  0x16   :  { %24 = dma.hbm_to_vmem [thread:$0]  %s698_s0, 256, %s19_s21, [#allocation4], %s634_s23, %s634_s23, %s635_s24  }
  0x17   :  { %s636_s30 = smov [#allocation8]  }
  0x18   :  { %s44_s6 = sshll.u32 %s636_s30, 4  ;;  %s45_s6 = int_to_ptr.vmem [resolvable:$true] %s44_s6 }
  0x19   :  { %s594_s7 = scalar_lea.vmem %s45_s6, 2048  ;;  %p599_p11 = scmp.lt.s32.totalorder %s45_s6, %s45_s6 }
  0x1a   :  { %p595_p10 = scmp.ne.s32.totalorder %s45_s6, %s594_s7  ;;  %p600_p12 = scmp.lt.s32.totalorder %s594_s7, %s594_s7 }
  0x1c   :  { %p601_p13 = por %p600_p12, %p599_p11 }
  0x1e   :  { %p602_p0 = pnand %p601_p13, %p595_p10 }
  0x20   :  { %605 = shalt.err (!%p602_p0)
}
  0x21   :  { %s637_s1 = smov 64   ;;  %s638_s8 = smov 4  }
  0x22   :  { %50 = dma.hbm_to_vmem [thread:$0]  %s701_s3, 2048, %s45_s6, [#allocation7], %s637_s1, %s637_s1, %s638_s8  }
  0x23   :  { %626 = dma.done.wait [#allocation4], 256  }
  0x24   :  { %627 = vsyncadd [#allocation4], 4294967040 }
  0x25   :  { %628 = dma.done.wait [#allocation7], 4096  }
  0x26   :  { %629 = vsyncadd [#allocation7], 4294963200  ;;  %v639_v0 = vmov 0   ;;  %v506_v1 = vld [vmem:[#allocation6 + $0x74] ss:$8 sps:$4 sm:$0xff]   ;;  %v534_v16 = vld [vmem:[#allocation8 + $0x68] sm:$0xff]   ;;  %v84_v36 = vlaneseq }
  0x27   :  { %206 = vmatprep.mubr.bf16.mxu0 %v639_v0  ;;  %v508_v2 = vld [vmem:[#allocation6 + $0x70] ss:$8 sps:$4 sm:$0xff]   ;;  %174 = vmatprep.subr.bf16.mxu0 %v506_v1  ;;  %v509_v3 = vld [vmem:[#allocation6 + $0x64] ss:$8 sps:$4 sm:$0xff]   ;;  %v511_v4 = vld [vmem:[#allocation6 + $0x60] ss:$8 sps:$4 sm:$0xff]  }
  0x28   :  { %175 = vmatpush1.bf16.msra.mxu0 %v508_v2  ;;  %v512_v5 = vld [vmem:[#allocation6 + $0x54] ss:$8 sps:$4 sm:$0xff]   ;;  %v514_v6 = vld [vmem:[#allocation6 + $0x50] ss:$8 sps:$4 sm:$0xff]   ;;  %v515_v7 = vld [vmem:[#allocation6 + $0x44] ss:$8 sps:$4 sm:$0xff]  }
  0x29   :  { %176 = vmatprep.subr.bf16.mxu0 %v509_v3  ;;  %v517_v8 = vld [vmem:[#allocation6 + $0x40] ss:$8 sps:$4 sm:$0xff]   ;;  %v518_v9 = vld [vmem:[#allocation6 + $0x34] ss:$8 sps:$4 sm:$0xff]   ;;  %v520_v11 = vld [vmem:[#allocation6 + $0x30] ss:$8 sps:$4 sm:$0xff]  }
  0x2a   :  { %v530_v10 = vld [vmem:[#allocation8 + $0x78] sm:$0xff]   ;;  %v521_v13 = vld [vmem:[#allocation6 + $0x24] ss:$8 sps:$4 sm:$0xff]   ;;  %v532_v14 = vld [vmem:[#allocation8 + $0x70] sm:$0xff]   ;;  %v85_v37 = vshrl.u32 %v84_v36, 7  ;;  %s640_s12 = smov [#allocation9]  }
  0x2b   :  { %v531_v12 = vld [vmem:[#allocation8 + $0x38] sm:$0xff]   ;;  %475 = vmatprep.subr.bf16.mxu1 %v530_v10  ;;  %v533_v15 = vld [vmem:[#allocation8 + $0x30] sm:$0xff]   ;;  %v523_v17 = vld [vmem:[#allocation6 + $0x20] ss:$8 sps:$4 sm:$0xff]   ;;  %s429_s13 = sshll.u32 %s640_s12, 4  ;;  %s430_s13 = int_to_ptr.vmem [resolvable:$true] %s429_s13 }
  0x2c   :  { %177 = vmatpush1.bf16.msra.mxu0 %v511_v4  ;;  %476 = vmatpush3.bf16.msra.mxu1 %v531_v12  ;;  %v524_v18 = vld [vmem:[#allocation6 + $0x14] ss:$8 sps:$4 sm:$0xff]   ;;  %v535_v19 = vld [vmem:[#allocation8 + $0x28] sm:$0xff]   ;;  %v536_v20 = vld [vmem:[#allocation8 + $0x60] sm:$0xff]   ;;  %v90_v38 = vsub.s32 1, %v85_v37  ;;  %v86_v39 = vsub.s32 0, %v85_v37  ;;  %p611_p2 = scmp.lt.s32.totalorder %s430_s13, %s430_s13 }
  0x2d   :  { %178 = vmatprep.subr.bf16.mxu0 %v512_v5  ;;  %477 = vmatprep.subr.bf16.mxu1 %v532_v14  ;;  %v526_v21 = vld [vmem:[#allocation6 + $0x10] ss:$8 sps:$4 sm:$0xff]   ;;  %v537_v22 = vld [vmem:[#allocation8 + $0x20] sm:$0xff]   ;;  %v542_v32 = vld [vmem:[#allocation8 + $0x48] sm:$0xff]   ;;  %s606_s14 = scalar_lea.vmem %s430_s13, 256 }
  0x2e   :  { %v527_v23 = vld [vmem:[#allocation6 + $0x4] ss:$8 sps:$4 sm:$0xff]   ;;  %v538_v24 = vld [vmem:[#allocation8 + $0x58] sm:$0xff]   ;;  %v529_v25 = vld [vmem:[#allocation6] ss:$8 sps:$4 sm:$0xff]   ;;  %p607_p1 = scmp.ne.s32.totalorder %s430_s13, %s606_s14  ;;  %p612_p3 = scmp.lt.s32.totalorder %s606_s14, %s606_s14 }
  0x2f   :  { %v63_v26 = vld [vmem:[#allocation3] sm:$0xff]  ;;  %v64_v27 = vld [vmem:[#allocation3 + $0x8] sm:$0xff]  ;;  %v543_v33 = vld [vmem:[#allocation8 + $0x8] sm:$0xff]  }
  0x30   :  { %179 = vmatpush1.bf16.msra.mxu0 %v514_v6  ;;  %478 = vmatpush3.bf16.msra.mxu1 %v533_v15  ;;  %v539_v28 = vld [vmem:[#allocation8 + $0x18] sm:$0xff]   ;;  %v65_v29 = vpack.c.bf16 %v64_v27, %v63_v26  ;;  %v540_v30 = vld [vmem:[#allocation8 + $0x50] sm:$0xff]   ;;  %v544_v34 = vld [vmem:[#allocation8 + $0x40] sm:$0xff]   ;;  %p613_p4 = por %p612_p3, %p611_p2 }
  0x31   :  { %180 = vmatprep.subr.bf16.mxu0 %v515_v7  ;;  %479 = vmatprep.subr.bf16.mxu1 %v534_v16  ;;  %v541_v31 = vld [vmem:[#allocation8 + $0x10] sm:$0xff]   ;;  %v545_v35 = vld [vmem:[#allocation8] sm:$0xff]  }
  0x32   :  { %v82_v40 = vld [vmem:[%s700_s2] sm:$0x3]  ;;  %p614_p5 = pnand %p613_p4, %p607_p1 }
  0x33   :  { %v91_v42 = vrot.slane %v82_v40, %v90_v38  ;;  %v87_v43 = vrot.slane %v82_v40, %v86_v39  ;;  %v474_v59 = vld [vmem:[%s702_s4] ss:$0 sm:$0xff] }
  0x34   :  { %181 = vmatpush1.bf16.msra.mxu0 %v517_v8  ;;  %480 = vmatpush3.bf16.msra.mxu1 %v535_v19 }
  0x35   :  { %182 = vmatprep.subr.bf16.mxu0 %v518_v9  ;;  %481 = vmatprep.subr.bf16.mxu1 %v536_v20 }
  0x38   :  { %183 = vmatpush1.bf16.msra.mxu0 %v520_v11  ;;  %482 = vmatpush3.bf16.msra.mxu1 %v537_v22 }
  0x39   :  { %184 = vmatprep.subr.bf16.mxu0 %v521_v13  ;;  %483 = vmatprep.subr.bf16.mxu1 %v538_v24 }
  0x3c   :  { %185 = vmatpush1.bf16.msra.mxu0 %v523_v17  ;;  %484 = vmatpush3.bf16.msra.mxu1 %v539_v28 }
  0x3d   :  { %186 = vmatprep.subr.bf16.mxu0 %v524_v18  ;;  %485 = vmatprep.subr.bf16.mxu1 %v540_v30 }
  0x40   :  { %187 = vmatpush1.bf16.msra.mxu0 %v526_v21  ;;  %486 = vmatpush3.bf16.msra.mxu1 %v541_v31 }
  0x41   :  { %188 = vmatprep.subr.bf16.mxu0 %v527_v23  ;;  %487 = vmatprep.subr.bf16.mxu1 %v542_v32 }
  0x44   :  { %189 = vmatpush1.bf16.msra.mxu0 %v529_v25  ;;  %488 = vmatpush3.bf16.msra.mxu1 %v543_v33 }
  0x45   :  { %489 = vmatprep.subr.bf16.mxu1 %v544_v34 }
  0x47   :  { %207 = vmatmul.mubr.bf16.vlgmr.msra.gmra.mxu0 %v65_v29 }
  0x48   :  { %490 = vmatpush3.bf16.msra.mxu1 %v545_v35 }
 0x107   :  { %v208_v41 = vpop.f32.mrf.mxu0 }
 0x108   :  { %v209_v48 = vadd.f32 %v208_v41, %v87_v43 }
 0x109   :  { %v210_v44 = vpop.f32.mrf.mxu0 }
 0x10a   :  { %v211_v46 = vadd.f32 %v210_v44, %v91_v42  ;;  %v217_v54 = vmax.f32 %v209_v48, 0.0 }
 0x10b   :  { %v212_v45 = vpop.f32.mrf.mxu0 }
 0x10c   :  { %v213_v47 = vadd.f32 %v212_v45, %v87_v43  ;;  %v218_v52 = vmax.f32 %v211_v46, 0.0 }
 0x10d   :  { %v214_v49 = vpop.f32.mrf.mxu0 }
 0x10e   :  { %v215_v50 = vadd.f32 %v214_v49, %v91_v42  ;;  %v219_v51 = vmax.f32 %v213_v47, 0.0 }
 0x110   :  { %v220_v53 = vmax.f32 %v215_v50, 0.0  ;;  %v221_v56 = vpack.c.bf16 %v219_v51, %v217_v54 }
 0x112   :  { %v222_v55 = vpack.c.bf16 %v220_v53, %v218_v52 }
 0x114   :  { %383 = vmatprep.mubr.bf16.mxu1 %v222_v55 }
 0x115   :  { %384 = vmatmul.mubr.bf16.vlgmr.msra.gmra.mxu1 %v221_v56 }
 0x1d5   :  { %v491_v57 = vpop.f32.mrf.mxu1 }
 0x1d7   :  { %v492_v58 = vpop.f32.mrf.mxu1 }
 0x1d8   :  { %v493_v60 = vadd.f32 %v492_v58, %v491_v57 }
 0x1d9   :  { %v494_v61 = vpop.f32.mrf.mxu1 }
 0x1da   :  { %v420_v62 = vadd.f32 %v493_v60, %v474_v59 }
 0x1db   :  { %v495_v63 = vpop.f32.mrf.mxu1 }
 0x1dc   :  { %422 = vst [vmem:[#allocation9] sm:$0xff] %v420_v62  ;;  %v496_v0 = vadd.f32 %v495_v63, %v494_v61 }
 0x1de   :  { %v421_v1 = vadd.f32 %v496_v0, %v474_v59 }
 0x1e0   :  { %423 = vst [vmem:[#allocation9 + $0x8] sm:$0xff] %v421_v1 }
 0x1e1   :  { %617 = shalt.err (!%p614_p5)
}
 0x1e2   :  { %435 = dma.vmem_to_hbm [thread:$0]  %s430_s13, 256, %s703_s5, [#allocation5], %s634_s23, %s634_s23, %s635_s24  }
 0x1e3   :  { %630 = dma.done.wait [#allocation5], 256  }
 0x1e4   :  { %631 = vsyncadd [#allocation5], 4294967040 }
 0x1e5   :  { %439 = vsyncpa [#allocation4], 1 }
 0x1e6   :  { %440 = vsyncpa [#allocation7], 1 }
 0x1e7   :  { %441 = vsyncpa [#allocation5], 1 }

</bundles_post_ra>
